<compile_context>
chip_gen: v5e
topology: v5e:2x2
jax: 0.10.0
libtpu: 0.0.40
codegen_flags: <defaults>
</compile_context>

<pallas_src>
import functools

import jax
import jax.numpy as jnp
from jax.experimental import pallas as pl
from jax.experimental.pallas import tpu as pltpu


def _round_up(x, m):
    return ((x + m - 1) // m) * m


# --------------------------------------------------------------------------
# Kernel: full encoder+decoder forward for one batch tile.
# refs = (x_ref, w1_ref, b1_ref, ..., wn_ref, bn_ref, o_ref).
# Weights are pre-transposed (Din, Dout), lane-padded, stored bf16.
# Activations stay in vregs/VMEM and are cast to the weight dtype right
# before each MXU dot; accumulation, bias-add and ReLU are f32.
# --------------------------------------------------------------------------
def _fused_mlp_kernel(*refs, num_layers):
    x_ref = refs[0]
    o_ref = refs[-1]
    h = x_ref[...].astype(jnp.float32)
    for layer in range(num_layers):
        w_ref = refs[1 + 2 * layer]
        b_ref = refs[2 + 2 * layer]
        h = jnp.dot(h.astype(w_ref.dtype), w_ref[...],
                    preferred_element_type=jnp.float32)
        h = jnp.maximum(h + b_ref[...].astype(jnp.float32), 0.0)  # f32 ReLU
    o_ref[...] = h.astype(o_ref.dtype)


# --------------------------------------------------------------------------
# VMEM budgeting / tile selection
# --------------------------------------------------------------------------
def _vmem_estimate(tb, fused_params, x_itemsize, out_itemsize):
    din0 = fused_params[0][0].shape[0]
    dout_last = fused_params[-1][0].shape[1]
    max_hidden = max(w.shape[1] for w, _ in fused_params)
    # Buffered(1) => a single VMEM copy of every weight/bias.
    weight_bytes = sum(w.size * w.dtype.itemsize + b.size * b.dtype.itemsize
                       for w, b in fused_params)
    tile_bytes = (2 * tb * din0 * x_itemsize          # double-buffered x block
                  + 2 * tb * dout_last * out_itemsize  # double-buffered out
                  + 2 * tb * max_hidden * 4)           # f32 intermediates
    return weight_bytes + tile_bytes


def _pick_tile_b(B, fused_params, x_itemsize, out_itemsize,
                 max_tile=512, budget=24 * 1024 * 1024):
    """Pick the batch tile: <=512 rows, VMEM-budgeted, and >=2 grid tiles
    whenever B >= 16 so v7x's two TensorCores both get work."""
    if B <= 8:
        return B  # single tile; block shape equals the full array -> legal
    tb = min(max_tile, _round_up(pl.cdiv(B, 2), 8))
    while tb > 8 and _vmem_estimate(tb, fused_params,
                                    x_itemsize, out_itemsize) > budget:
        tb = max(8, _round_up(tb // 2, 8))
    return tb


# --------------------------------------------------------------------------
# One pallas_call running the whole autoencoder forward.
# --------------------------------------------------------------------------
def fused_autoencoder_forward(fused_params, x):
    B, din0 = x.shape
    dout_last = fused_params[-1][0].shape[1]
    out_itemsize = x.dtype.itemsize
    tb = _pick_tile_b(B, fused_params, x.dtype.itemsize, out_itemsize)

    in_specs = [pl.BlockSpec((tb, din0), lambda i: (i, 0))]
    args = [x]
    for w, b in fused_params:
        din, dout = w.shape
        # Constant index_map + single buffer: weights/bias stay VMEM-resident
        # across batch tiles with no double-buffer overhead.
        in_specs.append(pl.BlockSpec((din, dout), lambda i: (0, 0),
                                     pipeline_mode=pl.Buffered(1)))
        in_specs.append(pl.BlockSpec((1, dout), lambda i: (0, 0),
                                     pipeline_mode=pl.Buffered(1)))
        args += [w, b]

    flops = 2 * B * sum(w.shape[0] * w.shape[1] for w, _ in fused_params)
    bytes_accessed = (x.size * x.dtype.itemsize
                      + B * dout_last * out_itemsize
                      + sum(w.size * w.dtype.itemsize
                            + b.size * b.dtype.itemsize
                            for w, b in fused_params))
    cost = pl.CostEstimate(flops=flops, transcendentals=0,
                           bytes_accessed=bytes_accessed)

    est = _vmem_estimate(tb, fused_params, x.dtype.itemsize, out_itemsize)
    # Raise the scoped limit only as far as physically available everywhere
    # (v7x has 64 MiB total VMEM; v5e/v6e have 128 MiB).
    vmem_limit = int(min(64 * 1024 * 1024,
                         max(32 * 1024 * 1024, 2 * est)))

    kernel = functools.partial(_fused_mlp_kernel, num_layers=len(fused_params))
    return pl.pallas_call(
        kernel,
        out_shape=jax.ShapeDtypeStruct((B, dout_last), x.dtype),
        grid=(pl.cdiv(B, tb),),
        in_specs=in_specs,
        out_specs=pl.BlockSpec((tb, dout_last), lambda i: (i, 0)),
        cost_estimate=cost,
        compiler_params=pltpu.CompilerParams(
            dimension_semantics=("parallel",),  # independent batch tiles
            vmem_limit_bytes=vmem_limit,
        ),
    )(*args)


# --------------------------------------------------------------------------
# Parameter construction (PyTorch layout) and one-time kernel-layout prep.
# --------------------------------------------------------------------------
def init_linear_params(key, in_dim, out_dim):
    """Deterministic PyTorch-style init: U(-1/sqrt(in), 1/sqrt(in))."""
    kw, kb = jax.random.split(key)
    bound = 1.0 / jnp.sqrt(jnp.float32(in_dim))
    w = jax.random.uniform(kw, (out_dim, in_dim), jnp.float32, -bound, bound)
    b = jax.random.uniform(kb, (out_dim,), jnp.float32, -bound, bound)
    return w, b


def build_autoencoder_params(key, encoder_layer_dims):
    """PyTorch-layout params: list of (W (out,in), b (out,)) per layer."""
    enc_dims = list(encoder_layer_dims)
    dec_dims = list(reversed(encoder_layer_dims))
    params = {"encoder": [], "decoder": []}
    for din, dout in zip(enc_dims[:-1], enc_dims[1:]):
        key, sub = jax.random.split(key)
        params["encoder"].append(init_linear_params(sub, din, dout))
    for din, dout in zip(dec_dims[:-1], dec_dims[1:]):
        key, sub = jax.random.split(key)
        params["decoder"].append(init_linear_params(sub, din, dout))
    return params


def prepare_fused_params(params, lane=128, weight_dtype=jnp.bfloat16):
    """One-time conversion to kernel layout.

    - transpose W to (Din, Dout) so the kernel does x @ W
    - cast W to `weight_dtype` (bf16 by default: native MXU path, half the
      streamed weight bytes); bias stays f32 (f32 bias-add/ReLU everywhere)
    - zero-pad every *internal* hidden dim up to 128 lanes so intermediates
      are lane-dense (exact: padded rows/cols/biases are zero, ReLU(0)=0).
      The first input dim and final output dim keep their true sizes.
    """
    layers = params["encoder"] + params["decoder"]
    n = len(layers)
    fused = []
    prev_pad_in = layers[0][0].shape[1]  # first layer's true Din
    for idx, (w, b) in enumerate(layers):
        dout, din = w.shape
        pad_in = prev_pad_in
        pad_out = dout if idx == n - 1 else _round_up(dout, lane)
        w_t = jnp.zeros((pad_in, pad_out), jnp.float32).at[:din, :dout].set(w.T)
        b2 = jnp.zeros((1, pad_out), jnp.float32).at[0, :dout].set(b)
        fused.append((w_t.astype(weight_dtype), b2))
        prev_pad_in = pad_out
    return fused


if __name__ == "__main__":
    encoder_layer_dims = [64, 32, 16]  # encoder: 64->32->16, decoder: 16->32->64
    batch = 64                         # small, but exercises the 2-tile grid

    key = jax.random.PRNGKey(0)
    key_p, key_x = jax.random.split(key)
    params = build_autoencoder_params(key_p, encoder_layer_dims)
    fused_params = prepare_fused_params(params)          # done once at init
    x = jax.random.normal(key_x, (batch, encoder_layer_dims[0]), jnp.float32)

    forward = jax.jit(fused_autoencoder_forward)
    out = forward(fused_params, x)
    jax.block_until_ready(out)

    # Pure-JAX f32 reference against the original (unpadded, f32) params.
    def ref_forward(p, xx):
        h = xx
        for w, b in p["encoder"] + p["decoder"]:
            h = jnp.maximum(h @ w.T + b, 0.0)
        return h

    ref = ref_forward(params, x)
    assert out.shape == (batch, encoder_layer_dims[0])
    max_err = float(jnp.max(jnp.abs(out - ref)))
    # bf16 weights/activations on the MXU (f32 accumulate) vs pure-f32 ref:
    # a few 1e-3 of absolute error is expected; 2e-2 is a safe bound here.
    assert jnp.allclose(out, ref, atol=2e-2, rtol=2e-2), max_err
    print("KERNEL_OK")
</pallas_src>

<mosaic_0001>
module attributes {stable_mosaic.version = 11 : i64} {
  func.func @_fused_mlp_kernel(%arg0: i32, %arg1: memref<32x64xf32, #tpu.memory_space<vmem>>, %arg2: memref<64x128xbf16, #tpu.memory_space<vmem>>, %arg3: memref<1x128xf32, #tpu.memory_space<vmem>>, %arg4: memref<128x128xbf16, #tpu.memory_space<vmem>>, %arg5: memref<1x128xf32, #tpu.memory_space<vmem>>, %arg6: memref<128x128xbf16, #tpu.memory_space<vmem>>, %arg7: memref<1x128xf32, #tpu.memory_space<vmem>>, %arg8: memref<128x64xbf16, #tpu.memory_space<vmem>>, %arg9: memref<1x64xf32, #tpu.memory_space<vmem>>, %arg10: memref<32x64xf32, #tpu.memory_space<vmem>>) attributes {dimension_semantics = [#tpu.dimension_semantics<parallel>], iteration_bounds = array<i64: 2>, scalar_prefetch = 0 : i64, scratch_operands = 0 : i64, tpu.core_type = #tpu.core_type<tc>, window_params = [{transform_indices = @transform_0, window_bounds = array<i64: 32, 64>}, {pipeline_mode = #tpu.pipeline_mode<synchronous>, transform_indices = @transform_1, window_bounds = array<i64: 64, 128>}, {pipeline_mode = #tpu.pipeline_mode<synchronous>, transform_indices = @transform_2, window_bounds = array<i64: 1, 128>}, {pipeline_mode = #tpu.pipeline_mode<synchronous>, transform_indices = @transform_3, window_bounds = array<i64: 128, 128>}, {pipeline_mode = #tpu.pipeline_mode<synchronous>, transform_indices = @transform_4, window_bounds = array<i64: 1, 128>}, {pipeline_mode = #tpu.pipeline_mode<synchronous>, transform_indices = @transform_5, window_bounds = array<i64: 128, 128>}, {pipeline_mode = #tpu.pipeline_mode<synchronous>, transform_indices = @transform_6, window_bounds = array<i64: 1, 128>}, {pipeline_mode = #tpu.pipeline_mode<synchronous>, transform_indices = @transform_7, window_bounds = array<i64: 128, 64>}, {pipeline_mode = #tpu.pipeline_mode<synchronous>, transform_indices = @transform_8, window_bounds = array<i64: 1, 64>}, {transform_indices = @transform_9, window_bounds = array<i64: 32, 64>}]} {
    %c0 = arith.constant 0 : index
    %c0_0 = arith.constant 0 : index
    %0 = vector.load %arg1[%c0, %c0_0] : memref<32x64xf32, #tpu.memory_space<vmem>>, vector<32x64xf32>
    %1 = arith.truncf %0 : vector<32x64xf32> to vector<32x64xbf16>
    %c0_1 = arith.constant 0 : index
    %c0_2 = arith.constant 0 : index
    %2 = vector.load %arg2[%c0_1, %c0_2] : memref<64x128xbf16, #tpu.memory_space<vmem>>, vector<64x128xbf16>
    %cst = arith.constant dense<0.000000e+00> : vector<32x128xf32>
    %3 = tpu.matmul %1, %2, %cst {dimension_numbers = #tpu.dot_dimension_numbers<[1], [0], [0], [1], [0, 0, 1, 1], [], []>} : vector<32x64xbf16>, vector<64x128xbf16>, vector<32x128xf32> -> vector<32x128xf32>
    %c0_3 = arith.constant 0 : index
    %c0_4 = arith.constant 0 : index
    %4 = vector.load %arg3[%c0_3, %c0_4] : memref<1x128xf32, #tpu.memory_space<vmem>>, vector<1x128xf32>
    %5 = vector.broadcast %4 : vector<1x128xf32> to vector<32x128xf32>
    %6 = arith.addf %3, %5 : vector<32x128xf32>
    %cst_5 = arith.constant 0.000000e+00 : f32
    %7 = vector.broadcast %cst_5 : f32 to vector<32x128xf32>
    %8 = arith.maximumf %6, %7 : vector<32x128xf32>
    %9 = arith.truncf %8 : vector<32x128xf32> to vector<32x128xbf16>
    %c0_6 = arith.constant 0 : index
    %c0_7 = arith.constant 0 : index
    %10 = vector.load %arg4[%c0_6, %c0_7] : memref<128x128xbf16, #tpu.memory_space<vmem>>, vector<128x128xbf16>
    %cst_8 = arith.constant dense<0.000000e+00> : vector<32x128xf32>
    %11 = tpu.matmul %9, %10, %cst_8 {dimension_numbers = #tpu.dot_dimension_numbers<[1], [0], [0], [1], [0, 0, 1, 1], [], []>} : vector<32x128xbf16>, vector<128x128xbf16>, vector<32x128xf32> -> vector<32x128xf32>
    %c0_9 = arith.constant 0 : index
    %c0_10 = arith.constant 0 : index
    %12 = vector.load %arg5[%c0_9, %c0_10] : memref<1x128xf32, #tpu.memory_space<vmem>>, vector<1x128xf32>
    %13 = vector.broadcast %12 : vector<1x128xf32> to vector<32x128xf32>
    %14 = arith.addf %11, %13 : vector<32x128xf32>
    %cst_11 = arith.constant 0.000000e+00 : f32
    %15 = vector.broadcast %cst_11 : f32 to vector<32x128xf32>
    %16 = arith.maximumf %14, %15 : vector<32x128xf32>
    %17 = arith.truncf %16 : vector<32x128xf32> to vector<32x128xbf16>
    %c0_12 = arith.constant 0 : index
    %c0_13 = arith.constant 0 : index
    %18 = vector.load %arg6[%c0_12, %c0_13] : memref<128x128xbf16, #tpu.memory_space<vmem>>, vector<128x128xbf16>
    %cst_14 = arith.constant dense<0.000000e+00> : vector<32x128xf32>
    %19 = tpu.matmul %17, %18, %cst_14 {dimension_numbers = #tpu.dot_dimension_numbers<[1], [0], [0], [1], [0, 0, 1, 1], [], []>} : vector<32x128xbf16>, vector<128x128xbf16>, vector<32x128xf32> -> vector<32x128xf32>
    %c0_15 = arith.constant 0 : index
    %c0_16 = arith.constant 0 : index
    %20 = vector.load %arg7[%c0_15, %c0_16] : memref<1x128xf32, #tpu.memory_space<vmem>>, vector<1x128xf32>
    %21 = vector.broadcast %20 : vector<1x128xf32> to vector<32x128xf32>
    %22 = arith.addf %19, %21 : vector<32x128xf32>
    %cst_17 = arith.constant 0.000000e+00 : f32
    %23 = vector.broadcast %cst_17 : f32 to vector<32x128xf32>
    %24 = arith.maximumf %22, %23 : vector<32x128xf32>
    %25 = arith.truncf %24 : vector<32x128xf32> to vector<32x128xbf16>
    %c0_18 = arith.constant 0 : index
    %c0_19 = arith.constant 0 : index
    %26 = vector.load %arg8[%c0_18, %c0_19] : memref<128x64xbf16, #tpu.memory_space<vmem>>, vector<128x64xbf16>
    %cst_20 = arith.constant dense<0.000000e+00> : vector<32x64xf32>
    %27 = tpu.matmul %25, %26, %cst_20 {dimension_numbers = #tpu.dot_dimension_numbers<[1], [0], [0], [1], [0, 0, 1, 1], [], []>} : vector<32x128xbf16>, vector<128x64xbf16>, vector<32x64xf32> -> vector<32x64xf32>
    %c0_21 = arith.constant 0 : index
    %c0_22 = arith.constant 0 : index
    %28 = vector.load %arg9[%c0_21, %c0_22] : memref<1x64xf32, #tpu.memory_space<vmem>>, vector<1x64xf32>
    %29 = vector.broadcast %28 : vector<1x64xf32> to vector<32x64xf32>
    %30 = arith.addf %27, %29 : vector<32x64xf32>
    %cst_23 = arith.constant 0.000000e+00 : f32
    %31 = vector.broadcast %cst_23 : f32 to vector<32x64xf32>
    %32 = arith.maximumf %30, %31 : vector<32x64xf32>
    %c0_24 = arith.constant 0 : index
    %c0_25 = arith.constant 0 : index
    %33 = vector.load %arg10[%c0_24, %c0_25] : memref<32x64xf32, #tpu.memory_space<vmem>>, vector<32x64xf32>
    tpu.vector_store %arg10[%c0_24, %c0_25], %32 {strides = array<i32>} : memref<32x64xf32, #tpu.memory_space<vmem>>, vector<32x64xf32>,
    return
  }
  func.func @transform_0(%arg0: i32) -> (i32, i32) {
    %c0_i32 = arith.constant 0 : i32
    %c0_i32_0 = arith.constant 0 : i32
    return %arg0, %c0_i32 : i32, i32
  }
  func.func @transform_1(%arg0: i32) -> (i32, i32) {
    %c0_i32 = arith.constant 0 : i32
    %c0_i32_0 = arith.constant 0 : i32
    %c0_i32_1 = arith.constant 0 : i32
    return %c0_i32, %c0_i32_0 : i32, i32
  }
  func.func @transform_2(%arg0: i32) -> (i32, i32) {
    %c0_i32 = arith.constant 0 : i32
    %c0_i32_0 = arith.constant 0 : i32
    %c0_i32_1 = arith.constant 0 : i32
    return %c0_i32, %c0_i32_0 : i32, i32
  }
  func.func @transform_3(%arg0: i32) -> (i32, i32) {
    %c0_i32 = arith.constant 0 : i32
    %c0_i32_0 = arith.constant 0 : i32
    %c0_i32_1 = arith.constant 0 : i32
    return %c0_i32, %c0_i32_0 : i32, i32
  }
  func.func @transform_4(%arg0: i32) -> (i32, i32) {
    %c0_i32 = arith.constant 0 : i32
    %c0_i32_0 = arith.constant 0 : i32
    %c0_i32_1 = arith.constant 0 : i32
    return %c0_i32, %c0_i32_0 : i32, i32
  }
  func.func @transform_5(%arg0: i32) -> (i32, i32) {
    %c0_i32 = arith.constant 0 : i32
    %c0_i32_0 = arith.constant 0 : i32
    %c0_i32_1 = arith.constant 0 : i32
    return %c0_i32, %c0_i32_0 : i32, i32
  }
  func.func @transform_6(%arg0: i32) -> (i32, i32) {
    %c0_i32 = arith.constant 0 : i32
    %c0_i32_0 = arith.constant 0 : i32
    %c0_i32_1 = arith.constant 0 : i32
    return %c0_i32, %c0_i32_0 : i32, i32
  }
  func.func @transform_7(%arg0: i32) -> (i32, i32) {
    %c0_i32 = arith.constant 0 : i32
    %c0_i32_0 = arith.constant 0 : i32
    %c0_i32_1 = arith.constant 0 : i32
    return %c0_i32, %c0_i32_0 : i32, i32
  }
  func.func @transform_8(%arg0: i32) -> (i32, i32) {
    %c0_i32 = arith.constant 0 : i32
    %c0_i32_0 = arith.constant 0 : i32
    %c0_i32_1 = arith.constant 0 : i32
    return %c0_i32, %c0_i32_0 : i32, i32
  }
  func.func @transform_9(%arg0: i32) -> (i32, i32) {
    %c0_i32 = arith.constant 0 : i32
    %c0_i32_0 = arith.constant 0 : i32
    return %arg0, %c0_i32 : i32, i32
  }
}

</mosaic_0001>

<bundles_post_ra>
// kernel: fused_autoencoder_forward.1
= control target key start
LH: loop header
LB: loop body
LE: loop exit
PB: predicated region body
PF: predicated region fallthrough
CT: control target
= control target key end

     0   :  { %14 = vsyncpa [#allocation3], 0  ;;  %s1402_s0 = inlined_call_operand.vmem [shape: f32[64,64], index: 0, kind: input, shape index: {}]   ;;  %s1403_s1 = inlined_call_operand.vmem [shape: bf16[64,128], index: 1, kind: input, shape index: {}]   ;;  %s1404_s2 = inlined_call_operand.vmem [shape: f32[1,128], index: 2, kind: input, shape index: {}]   ;;  %s1405_s3 = inlined_call_operand.hbm [shape: bf16[128,128], index: 3, kind: input, shape index: {}]   ;;  %s1406_s4 = inlined_call_operand.vmem [shape: f32[1,128], index: 4, kind: input, shape index: {}]   ;;  %s1407_s5 = inlined_call_operand.hbm [shape: bf16[128,128], index: 5, kind: input, shape index: {}]   ;;  %s1408_s6 = inlined_call_operand.vmem [shape: f32[1,128], index: 6, kind: input, shape index: {}]   ;;  %s1409_s7 = inlined_call_operand.vmem [shape: bf16[128,64], index: 7, kind: input, shape index: {}]   ;;  %s1410_s8 = inlined_call_operand.vmem [shape: f32[1,64], index: 8, kind: input, shape index: {}]   ;;  %s1411_s9 = inlined_call_operand.hbm [shape: f32[64,64], index: 9, kind: output, shape index: {}]  }
   0x1   :  { %15 = vsyncpa [#allocation6], 0 }
   0x2   :  { %16 = vsyncpa [#allocation4], 0 }
   0x3   :  { %18 = vsyncpa [#allocation4 + $0x1], 0  ;;  %s1239_s30 = smov 0   ;;  %s1241_s10 = smov 0  }
   0x4   :  { %s1243_s11 = smov 0   ;;  %s1245_s12 = smov 0  }
   0x5 LB: > { %s1260_s13 = sadd.s32 4294967295, %s1181_s12   ;;  %s824_s14 = sadd.s32 4294967294, %s1181_s12   ;;  %s1181_s12 = sphi %s1245_s12, %s1418_s12   ;;  %s1177_s11 = sphi %s1243_s11, %s1417_s11   ;;  %s1173_s10 = sphi %s1241_s10, %s1416_s10   ;;  %s1169_s30 = sphi %s1239_s30, %s1415_s30  }
   0x6   : > { %s1264_s15 = sadd.s32 1, %s1181_s12   ;;  %s225_s16 = sadd.s32 1, %s1177_s11 }
   0x7   : > { %s222_s17 = ssub.s32 %s1181_s12, %s1264_s15  ;;  %p235_p0 = scmp.ne.s32.totalorder %s1177_s11, %s1173_s10 }
   0x8   : > { %p223_p1 = scmp.eq.s32.totalorder %s222_s17, 0  ;;  %p236_p2 = scmp.eq.s32.totalorder %s1260_s13, 1 }
   0x9   : > { %p241_p3 = scmp.ne.s32.totalorder %s1173_s10, %s1169_s30  ;;  %p242_p4 = scmp.eq.s32.totalorder %s824_s14, 1 }
   0xa   : > { %s1275_s18 = scalar_select %p223_p1, %s1177_s11, %s225_s16  }
   0xb   : > { %p1277_p5 = por %p236_p2, %p235_p0  ;;  %p1281_p6 = por %p242_p4, %p241_p3 }
   0xc   : > { %p825_p7 = scmp.ge.s32.totalorder %s1181_s12, 1  ;;  %p249_p8 = scmp.lt.s32.totalorder %s1181_s12, 3 }
   0xd   : > { %p1004_p9 = scmp.eq.s32.totalorder %s1260_s13, 0  ;;  %s266_s24 = sshll.u32 %s1405_s3, 4  ;;  %s267_s24 = int_to_ptr.hbm [resolvable:$true] %s266_s24 }
   0xe   : > { %p1288_p10 = pnand %p825_p7, %p249_p8  ;;  %s1183_s25 = smov [#allocation2]  }
   0xf   : > { %s268_s26 = sshll.u32 %s1183_s25, 4  ;;  %s283_s29 = sshll.u32 %s1407_s5, 4  ;;  %s269_s26 = int_to_ptr.vmem [resolvable:$true] %s268_s26  ;;  %s284_s29 = int_to_ptr.hbm [resolvable:$true] %s283_s29 }
  0x10   : > { %p993_p11 = pneg %p1288_p10  ;;  %s1184_s14 = smov 64  }
  0x11   : > { %s1185_s16 = smov 4   ;;  %s1186_s17 = smov [#allocation5]  }
  0x12   : > { %p994_p12 = pnand %p1004_p9, %p993_p11  ;;  %s285_s22 = sshll.u32 %s1186_s17, 4  ;;  %s286_s22 = int_to_ptr.vmem [resolvable:$true] %s285_s22 }
  0x13   : > { %319 = sbr.rel (%p1288_p10) target bundleno = 633 (0x279), region = 56 }
  0x14   : > { %996 = dma.hbm_to_vmem [thread:$0]  (!%p994_p12), %s267_s24, 1024, %s269_s26, [#allocation3], %s1184_s14, %s1184_s14, %s1185_s16  }
  0x15   : > { %999 = dma.hbm_to_vmem [thread:$0]  (!%p994_p12), %s284_s29, 1024, %s286_s22, [#allocation6], %s1184_s14, %s1184_s14, %s1185_s16  }
  0x18   : > { %1156 = dma.done.wait (%p1004_p9), [#allocation3], 1024  }
  0x19   : > { %1158 = vsyncadd (%p1004_p9), [#allocation3], 4294966272 }
  0x1a   : > { %1160 = dma.done.wait (%p1004_p9), [#allocation6], 1024  }
  0x1b   : > { %1162 = vsyncadd (%p1004_p9), [#allocation6], 4294966272  ;;  %s833_s23 = sshll.u32 %s1260_s13, 2  ;;  %v957_v0 = vld [vmem:[%s1403_s1 + $0x18] sm:$0xff]  ;;  %v956_v1 = vld [vmem:[%s1403_s1 + $0x10] sm:$0xff]  ;;  %vm411_vm0 = vcmask 523264  }
  0x1c   : > { %p362_p13 = scmp.lt.s32.totalorder %s833_s23, 7  ;;  %422 = vmatpush.bf16.msra.mxu0 %v957_v0  ;;  %v965_v2 = vld [vmem:[#allocation2 + $0x38] sm:$0xff]  ;;  %v964_v3 = vld [vmem:[#allocation2 + $0x30] sm:$0xff]  ;;  %v955_v4 = vld [vmem:[%s1403_s1 + $0x8] sm:$0xff]  ;;  %s358_s22 = sand.u32 1, %s1173_s10  }
  0x1d   : > { %511 = vmatpush.bf16.msra.mxu1 %v965_v2  ;;  %v963_v5 = vld [vmem:[#allocation2 + $0x28] sm:$0xff]  ;;  %v954_v6 = vld [vmem:[%s1403_s1] sm:$0xff]  ;;  %v961_v14 = vld [vmem:[#allocation2 + $0x18] sm:$0xff]  ;;  %s832_s25 = sshll.u32 %s358_s22, 5  ;;  %s982_s26 = sshll.u32 %s1260_s13, 5 }
  0x1e   : > { %s1420_s23 = smov (!%p362_p13, %s833_s23), 7  ;;  %v962_v9 = vld [vmem:[#allocation2 + $0x20] sm:$0xff]  ;;  %v960_v15 = vld [vmem:[#allocation2 + $0x10] sm:$0xff]  ;;  %v959_v16 = vld [vmem:[#allocation2 + $0x8] sm:$0xff]  ;;  %s360_s21 = scalar_lea.vmem [#allocation7], %s832_s25 }
  0x1f   : > { %s834_s27 = sshll.u32 %s1420_s23, 3  ;;  %v958_v17 = vld [vmem:[#allocation2] sm:$0xff]  ;;  %v973_v18 = vld [vmem:[#allocation5 + $0x38] sm:$0xff]  ;;  %v972_v20 = vld [vmem:[#allocation5 + $0x30] sm:$0xff]  ;;  %s736_s29 = scalar_lea.hbm %s1411_s9, %s982_s26 }
  0x20   : > { %423 = vmatpush.bf16.msra.mxu0 %v956_v1  ;;  %s365_s17 = scalar_lea.vmem %s1402_s0, %s834_s27  ;;  %604 = vmatpush.bf16.msra.mxu2 %v973_v18  ;;  %v1047_v21 = vld [vmem:[%s1404_s2] ss:$0 sm:$0xff]  ;;  %v971_v22 = vld [vmem:[#allocation5 + $0x28] sm:$0xff]  ;;  %v969_v37 = vld [vmem:[#allocation5 + $0x18] sm:$0xff]  ;;  %s737_s14 = sshll.u32 %s360_s21, 4  ;;  %s738_s14 = int_to_ptr.vmem [resolvable:$true] %s737_s14 }
  0x21   : > { %512 = vmatpush.bf16.msra.mxu1 %v964_v3  ;;  %v369_v7 = vld [vmem:[%s365_s17] sm:$0xff]  ;;  %v370_v8 = vld [vmem:[%s365_s17 + $0x8] sm:$0xff]  ;;  %v371_v11 = vld [vmem:[%s365_s17 + $0x10] sm:$0xff]  ;;  %s739_s16 = sshll.u32 %s736_s29, 4  ;;  %s1131_s26 = scalar_lea.hbm %s1411_s9, 64  ;;  %s740_s16 = int_to_ptr.hbm [resolvable:$true] %s739_s16 }
  0x22   : > { %v373_v10 = vpack.c.bf16 %v370_v8, %v369_v7  ;;  %v372_v12 = vld [vmem:[%s365_s17 + $0x18] sm:$0xff]  ;;  %v970_v26 = vld [vmem:[#allocation5 + $0x20] sm:$0xff]  ;;  %v968_v38 = vld [vmem:[#allocation5 + $0x10] sm:$0xff]  ;;  %s725_s17 = scalar_lea.sflag [#allocation4], %s358_s22  ;;  %s1125_s24 = sshra.s32 %s740_s16, 4  ;;  %s1126_s24 = int_to_ptr.hbm [resolvable:$true] %s1125_s24 }
  0x23   : > { %v374_v13 = vpack.c.bf16 %v372_v12, %v371_v11  ;;  %v967_v39 = vld [vmem:[#allocation5 + $0x8] sm:$0xff]  ;;  %v966_v40 = vld [vmem:[#allocation5] sm:$0xff]  ;;  %v981_v41 = vld [vmem:[%s1409_s7 + $0x38] sm:$0xff]  ;;  %s1127_s13 = scalar_lea.hbm %s1126_s24, 32  ;;  %p1132_p3 = scmp.lt.s32.totalorder %s1126_s24, %s1411_s9 }
  0x24   : > { %424 = vmatpush.bf16.msra.mxu0 %v955_v4  ;;  %605 = vmatpush.bf16.msra.mxu2 %v972_v20  ;;  %v980_v43 = vld [vmem:[%s1409_s7 + $0x30] sm:$0xff]  ;;  %v1048_v44 = vld [vmem:[%s1406_s4] ss:$0 sm:$0xff]  ;;  %v979_v45 = vld [vmem:[%s1409_s7 + $0x28] sm:$0xff]  ;;  %p1128_p0 = scmp.ne.s32.totalorder %s1126_s24, %s1127_s13  ;;  %p1133_p4 = scmp.lt.s32.totalorder %s1131_s26, %s1127_s13 }
  0x25   : > { %513 = vmatpush.bf16.msra.mxu1 %v963_v5  ;;  %697 = vmatpush.bf16.msra.mxu3 %v981_v41  ;;  %v978_v49 = vld [vmem:[%s1409_s7 + $0x20] sm:$0xff]  ;;  %v977_v60 = vld [vmem:[%s1409_s7 + $0x18] sm:$0xff]  ;;  %v976_v61 = vld [vmem:[%s1409_s7 + $0x10] sm:$0xff] }
  0x26   : > { %v975_v62 = vld [vmem:[%s1409_s7 + $0x8] sm:$0xff]  ;;  %v974_v63 = vld [vmem:[%s1409_s7] sm:$0xff]  ;;  %p1129_p1 = pnand %p1128_p0, %p1277_p5  ;;  %p1134_p7 = por %p1133_p4, %p1132_p3 }
  0x27   : > { %v1049_v1 = vld [vmem:[%s1408_s6] ss:$0 sm:$0xff] }
  0x28   : > { %425 = vmatpush.bf16.msra.mxu0 %v954_v6  ;;  %606 = vmatpush.bf16.msra.mxu2 %v971_v22  ;;  %p1130_p2 = pneg %p1129_p1 }
  0x29   : > { %514 = vmatpush.bf16.msra.mxu1 %v962_v9  ;;  %698 = vmatpush.bf16.msra.mxu3 %v980_v43 }
  0x2a   : > { %p1135_p8 = pnand %p1134_p7, %p1130_p2 }
  0x2b   : > { %851 = vmatmul.msk.bf16.vlgmr.msra.gmra.mxu0 %vm411_vm0, %v373_v10 }
  0x2c   : > { %607 = vmatpush.bf16.msra.mxu2 %v970_v26 }
  0x2d   : > { %515 = vmatpush.bf16.msra.mxu1 %v961_v14  ;;  %699 = vmatpush.bf16.msra.mxu3 %v979_v45 }
  0x30   : > { %608 = vmatpush.bf16.msra.mxu2 %v969_v37 }
  0x31   : > { %516 = vmatpush.bf16.msra.mxu1 %v960_v15  ;;  %700 = vmatpush.bf16.msra.mxu3 %v978_v49  ;;  %v1050_v15 = vld [vmem:[%s1410_s8] ss:$0 sm:$0xff] }
  0x34   : > { %609 = vmatpush.bf16.msra.mxu2 %v968_v38 }
  0x35   : > { %517 = vmatpush.bf16.msra.mxu1 %v959_v16  ;;  %701 = vmatpush.bf16.msra.mxu3 %v977_v60 }
  0x38   : > { %610 = vmatpush.bf16.msra.mxu2 %v967_v39 }
  0x39   : > { %518 = vmatpush.bf16.msra.mxu1 %v958_v17  ;;  %702 = vmatpush.bf16.msra.mxu3 %v976_v61 }
  0x3b   : > { %852 = vmatmul.msk.bf16.gmra.mxu0 %vm411_vm0, %v374_v13 }
  0x3c   : > { %611 = vmatpush.bf16.msra.mxu2 %v966_v40 }
  0x3d   : > { %703 = vmatpush.bf16.msra.mxu3 %v975_v62 }
  0x41   : > { %704 = vmatpush.bf16.msra.mxu3 %v974_v63 }
  0xa8   : > { %v427_v19 = vpop.f32.mrf.mxu0 }
  0xa9   : > { %v428_v23 = vadd.f32 %v1047_v21, %v427_v19 }
  0xab   : > { %v437_v27 = vmax.f32 %v428_v23, 0.0 }
  0xb0   : > { %v429_v24 = vpop.f32.mrf.mxu0 }
  0xb1   : > { %v430_v25 = vadd.f32 %v1047_v21, %v429_v24 }
  0xb3   : > { %v438_v28 = vmax.f32 %v430_v25, 0.0 }
  0xb5   : > { %v441_v29 = vpack.c.bf16 %v438_v28, %v437_v27 }
  0xb7   : > { %519 = vmatmul.bf16.vlgmr.msra.gmra.mxu1 %v441_v29 }
  0xb8   : > { %v432_v30 = vpop.f32.mrf.mxu0 }
  0xb9   : > { %v433_v31 = vadd.f32 %v1047_v21, %v432_v30 }
  0xbb   : > { %v439_v34 = vmax.f32 %v433_v31, 0.0 }
  0xc0   : > { %v434_v32 = vpop.f32.mrf.mxu0 }
  0xc1   : > { %v435_v33 = vadd.f32 %v1047_v21, %v434_v32 }
  0xc3   : > { %v440_v35 = vmax.f32 %v435_v33, 0.0 }
  0xc5   : > { %v442_v36 = vpack.c.bf16 %v440_v35, %v439_v34 }
  0xc7   : > { %524 = vmatmul.bf16.gmra.mxu1 %v442_v36 }
 0x134   : > { %v520_v42 = vpop.f32.mrf.mxu1 }
 0x135   : > { %v521_v46 = vadd.f32 %v1048_v44, %v520_v42 }
 0x137   : > { %v530_v50 = vmax.f32 %v521_v46, 0.0 }
 0x13c   : > { %v522_v47 = vpop.f32.mrf.mxu1 }
 0x13d   : > { %v523_v48 = vadd.f32 %v1048_v44, %v522_v47 }
 0x13f   : > { %v531_v51 = vmax.f32 %v523_v48, 0.0 }
 0x141   : > { %v534_v52 = vpack.c.bf16 %v531_v51, %v530_v50 }
 0x143   : > { %612 = vmatmul.bf16.vlgmr.msra.gmra.mxu2 %v534_v52 }
 0x144   : > { %v525_v53 = vpop.f32.mrf.mxu1 }
 0x145   : > { %v526_v54 = vadd.f32 %v1048_v44, %v525_v53 }
 0x147   : > { %v532_v57 = vmax.f32 %v526_v54, 0.0 }
 0x14c   : > { %v527_v55 = vpop.f32.mrf.mxu1 }
 0x14d   : > { %v528_v56 = vadd.f32 %v1048_v44, %v527_v55 }
 0x14f   : > { %v533_v58 = vmax.f32 %v528_v56, 0.0 }
 0x151   : > { %v535_v59 = vpack.c.bf16 %v533_v58, %v532_v57 }
 0x153   : > { %617 = vmatmul.bf16.gmra.mxu2 %v535_v59 }
 0x1c6   : > { %v613_v0 = vpop.f32.mrf.mxu2 }
 0x1c7   : > { %v614_v2 = vadd.f32 %v1049_v1, %v613_v0 }
 0x1c9   : > { %v623_v5 = vmax.f32 %v614_v2, 0.0 }
 0x1ce   : > { %v615_v3 = vpop.f32.mrf.mxu2 }
 0x1cf   : > { %v616_v4 = vadd.f32 %v1049_v1, %v615_v3 }
 0x1d1   : > { %v624_v6 = vmax.f32 %v616_v4, 0.0 }
 0x1d3   : > { %v627_v7 = vpack.c.bf16 %v624_v6, %v623_v5 }
 0x1d5   : > { %705 = vmatmul.bf16.vlgmr.msra.gmra.mxu3 %v627_v7 }
 0x1d6   : > { %v618_v8 = vpop.f32.mrf.mxu2 }
 0x1d7   : > { %v619_v9 = vadd.f32 %v1049_v1, %v618_v8 }
 0x1d9   : > { %v625_v12 = vmax.f32 %v619_v9, 0.0 }
 0x1de   : > { %v620_v10 = vpop.f32.mrf.mxu2 }
 0x1df   : > { %v621_v11 = vadd.f32 %v1049_v1, %v620_v10 }
 0x1e1   : > { %v626_v13 = vmax.f32 %v621_v11, 0.0 }
 0x1e3   : > { %v628_v14 = vpack.c.bf16 %v626_v13, %v625_v12 }
 0x1e5   : > { %710 = vmatmul.bf16.gmra.mxu3 %v628_v14 }
 0x258   : > { %v706_v16 = vpop.f32.mrf.mxu3 }
 0x259   : > { %v707_v17 = vadd.f32 %v1050_v15, %v706_v16 }
 0x25b   : > { %v716_v18 = vmax.f32 %v707_v17, 0.0 }
 0x25d   : > { %720 = vst.msk [vmem:[%s360_s21] sm:$0xff] %vm411_vm0, %v716_v18 }
 0x260   : > { %v708_v19 = vpop.f32.mrf.mxu3 }
 0x261   : > { %v709_v20 = vadd.f32 %v1050_v15, %v708_v19 }
 0x263   : > { %v717_v21 = vmax.f32 %v709_v20, 0.0 }
 0x265   : > { %721 = vst.msk [vmem:[%s360_s21 + $0x8] sm:$0xff] %vm411_vm0, %v717_v21 }
 0x268   : > { %v711_v22 = vpop.f32.mrf.mxu3 }
 0x269   : > { %v712_v23 = vadd.f32 %v1050_v15, %v711_v22 }
 0x26b   : > { %v718_v24 = vmax.f32 %v712_v23, 0.0 }
 0x26d   : > { %722 = vst.msk [vmem:[%s360_s21 + $0x10] sm:$0xff] %vm411_vm0, %v718_v24 }
 0x270   : > { %v713_v25 = vpop.f32.mrf.mxu3 }
 0x271   : > { %v714_v26 = vadd.f32 %v1050_v15, %v713_v25 }
 0x273   : > { %v719_v27 = vmax.f32 %v714_v26, 0.0 }
 0x275   : > { %723 = vst.msk [vmem:[%s360_s21 + $0x18] sm:$0xff] %vm411_vm0, %v719_v27 }
 0x276   : > { %1138 = shalt.err (!%p1135_p8)
}
 0x277   : > { %s1187_s22 = smov 128   ;;  %s1188_s21 = smov 8  }
 0x278   : > { %991 = dma.vmem_to_hbm [thread:$0]  (%p1277_p5), %s738_s14, 512, %s740_s16, %s725_s17, %s1187_s22, %s1187_s22, %s1188_s21  }
 0x279 PF: > { %p1008_p9 = scmp.ge.s32.totalorder %s1181_s12, 2  ;;  %s754_s29 = sand.u32 1, %s1169_s30  }
 0x27a   : > { %s755_s23 = scalar_lea.sflag [#allocation4], %s754_s29 }
 0x27b   : > { %p1001_p10 = pnand %p1008_p9, %p1281_p6 }
 0x27d   : > { %p1002_p11 = pneg %p1001_p10 }
 0x27f   : > { %1164 = dma.done.wait (%p1002_p11), %s755_s23, 512  }
 0x280   : > { %1166 = vsyncadd (%p1002_p11), %s755_s23, 4294966784  ;;  %p21_p12 = scmp.ge.s32.totalorder %s1264_s15, 4   ;;  %s1415_s30 = smov %s1173_s10 }
 0x281   : > { %s1416_s10 = smov %s1177_s11  ;;  %s1417_s11 = smov %s1275_s18 }
 0x282   : > { %s1418_s12 = smov %s1264_s15  ;;  %23 = sbr.rel (!%p21_p12) target bundleno = 5 (0x5), region = 100 }
 0x287   :  { %761 = vsyncpa [#allocation3], 1 }
 0x288   :  { %763 = vsyncpa [#allocation3 + $0x1], 1 }
 0x289   :  { %764 = vsyncpa [#allocation6], 1 }
 0x28a   :  { %765 = vsyncpa [#allocation4], 1 }
 0x28b   :  { %767 = vsyncpa [#allocation4 + $0x1], 1 }

</bundles_post_ra>
